<compile_context>
chip_gen: v6e
topology: v6e:2x2x1
jax: 0.10.0
libtpu: 0.0.40
codegen_flags: <defaults>
</compile_context>

<pallas_src>
import functools

import numpy as np
import jax
import jax.numpy as jnp
from jax import lax
from jax.experimental import pallas as pl
from jax.experimental.pallas import tpu as pltpu


# ----------------------------------------------------------------------------
# Gaussian kernel (faithful port of the PyTorch gauss(), including its quirk).
# ----------------------------------------------------------------------------
def gauss_np(kernel_size, sigma):
    kernel = np.zeros((kernel_size, kernel_size))
    center = kernel_size // 2
    if sigma <= 0:
        sigma = ((kernel_size - 1) * 0.5 - 1) * 0.3 + 0.8
    s = sigma ** 2
    sum_val = 0.0
    for i in range(kernel_size):
        for j in range(kernel_size):
            x, y = (i - center, j - center)
            kernel[i, j] = np.exp(-(x ** 2 + y ** 2) / 2 * s)
            sum_val += kernel[i, j]
    return kernel / sum_val


def _gauss_sep_coeffs(kernel_size):
    """1-D separable factor v such that outer(v, v) == gauss_np(k, 2/k)."""
    c = kernel_size // 2
    sigma = 2.0 / kernel_size
    s = sigma ** 2
    v = np.exp(-((np.arange(kernel_size) - c) ** 2) / 2 * s)
    v = v / v.sum()
    return tuple(float(a) for a in v)


def _round_up(a, b):
    return (a + b - 1) // b * b


def _cdiv(a, b):
    return (a + b - 1) // b


def _neighbor_sum(x, d, axis):
    """x rolled by +d plus x rolled by -d along `axis` (cyclic, XLU)."""
    n = x.shape[axis]
    return (pltpu.roll(x, shift=d, axis=axis) +
            pltpu.roll(x, shift=n - d, axis=axis))


# ----------------------------------------------------------------------------
# Fast path: kernel_size == 1 (default).  One grid step = one batch element x
# one TH-row strip.  Vertical 3-tap is done with pltpu.roll on the strip plus
# a one-row halo patch above/below; no slab scratch, no full-strip round trip.
# ----------------------------------------------------------------------------
def _boundary_k1_kernel(mid_ref, top_ref, bot_ref, o_ref, *,
                        TH, HB, H, W, Wb, ignore_index):
    s = pl.program_id(1)
    x = mid_ref[0].astype(jnp.float32)                      # (TH, Wb)
    rowi = lax.broadcasted_iota(jnp.int32, (TH, Wb), 0)

    # Optional ignore_index remap (guard the zero lane-padding columns so a
    # padded 0 is never remapped when ignore_index == 0).
    if ignore_index is not None:
        cond = x == jnp.float32(ignore_index)
        if Wb > W:
            coli_g = lax.broadcasted_iota(jnp.int32, (TH, Wb), 1)
            cond = cond & (coli_g < W)
        x = jnp.where(cond, jnp.float32(255.0), x)

    # Zero garbage rows of the (partial) last strip -> emulates the conv's
    # zero padding at the bottom image edge as well.
    if H % TH != 0:
        x = jnp.where(rowi < (H - s * TH), x, 0.0)

    # One-row halos: the rows directly above / below the strip.
    trow = top_ref[0, HB - 1:HB, :].astype(jnp.float32)     # (1, Wb)
    brow = bot_ref[0, 0:1, :].astype(jnp.float32)           # (1, Wb)
    if ignore_index is not None:
        tcond = trow == jnp.float32(ignore_index)
        bcond = brow == jnp.float32(ignore_index)
        if Wb > W:
            coli_1 = lax.broadcasted_iota(jnp.int32, (1, Wb), 1)
            tcond = tcond & (coli_1 < W)
            bcond = bcond & (coli_1 < W)
        trow = jnp.where(tcond, jnp.float32(255.0), trow)
        brow = jnp.where(bcond, jnp.float32(255.0), brow)
    trow = jnp.where(s > 0, trow, 0.0)                      # top image edge
    brow = jnp.where((s + 1) * TH < H, brow, 0.0)           # bottom image edge

    # ---- 3x3 Laplacian, separable: vertical 3-tap then horizontal 3-tap ----
    up = pltpu.roll(x, shift=1, axis=0)                     # up[i] = x[i-1]
    dn = pltpu.roll(x, shift=TH - 1, axis=0)                # dn[i] = x[i+1]
    up = jnp.where(rowi == 0, trow, up)                     # patch halo rows
    dn = jnp.where(rowi == TH - 1, brow, dn)
    vs = x + up + dn

    rt = pltpu.roll(vs, shift=1, axis=1)                    # rt[:,j] = vs[:,j-1]
    lf = pltpu.roll(vs, shift=Wb - 1, axis=1)               # lf[:,j] = vs[:,j+1]
    if Wb == W:
        # No zero lane padding: the cyclic wrap would pull real data into the
        # image-edge columns -- emulate the conv's zero padding explicitly.
        coli = lax.broadcasted_iota(jnp.int32, (TH, Wb), 1)
        rt = jnp.where(coli == 0, 0.0, rt)
        lf = jnp.where(coli == Wb - 1, 0.0, lf)
    # else: wraps land in / source from the zero padding columns (never read).
    ws = vs + rt + lf

    # b_kernel = ones(3,3) with center -8  =>  conv = window_sum - 9*center
    lap = jnp.abs(ws - 9.0 * x)
    if ignore_index is not None:
        lap = jnp.where(lap >= 200.0, 0.0, lap)
    edge = jnp.where(lap > 0.0, jnp.float32(1.0), jnp.float32(0.0))

    # Normalized 1x1 Gaussian == 1.0 -> identity; store lane-dense.
    if Wb > W:
        o_ref[0] = edge[:, :W]
    else:
        o_ref[0] = edge


# ----------------------------------------------------------------------------
# General path: kernel_size > 1.  Keeps the halo slab so the separable k x k
# Gaussian can consume edge values computed in the halo rows.  Invariant:
# HB >= p + 1 keeps the cyclic roll wrap rows out of every consumed row.
# ----------------------------------------------------------------------------
def _boundary_gauss_kernel(mid_ref, top_ref, bot_ref, o_ref, slab_ref, *,
                           TH, HB, H, W, ksize, g1d, ignore_index):
    s = pl.program_id(1)
    L, Wb = slab_ref.shape                                  # L = TH + 2*HB
    p = ksize // 2

    slab_ref[0:HB, :] = top_ref[0].astype(jnp.float32)
    slab_ref[HB:HB + TH, :] = mid_ref[0].astype(jnp.float32)
    slab_ref[HB + TH:L, :] = bot_ref[0].astype(jnp.float32)
    x = slab_ref[...]

    gr = (s * TH - HB) + lax.broadcasted_iota(jnp.int32, (L, Wb), 0)
    gc = lax.broadcasted_iota(jnp.int32, (L, Wb), 1)
    row_ok = (gr >= 0) & (gr < H)
    valid = row_ok & (gc < W)

    # Zero rows above / below the image (clamped halos, H-overhang) -> this is
    # exactly the conv's zero padding; also kills any stale-VMEM garbage.
    x = jnp.where(row_ok, x, 0.0)
    if ignore_index is not None:
        x = jnp.where(valid & (x == jnp.float32(ignore_index)),
                      jnp.float32(255.0), x)

    # ---- separable 3x3 box sum (cyclic rolls; wraps are out of reach) ------
    csum = x + _neighbor_sum(x, 1, axis=1)
    wsum = csum + _neighbor_sum(csum, 1, axis=0)
    lap = jnp.abs(wsum - 9.0 * x)
    if ignore_index is not None:
        lap = jnp.where(lap >= 200.0, 0.0, lap)
    edge = jnp.where(lap > 0.0, jnp.float32(1.0), jnp.float32(0.0))
    # Zero edges produced outside the image so the Gaussian sees zero padding.
    edge = jnp.where(valid, edge, 0.0)

    # ---- separable Gaussian: lane (W) pass, then sublane (H) pass ----------
    acc = g1d[p] * edge
    for d in range(1, p + 1):
        acc = acc + g1d[p + d] * _neighbor_sum(edge, d, axis=1)
    out = g1d[p] * acc
    for d in range(1, p + 1):
        out = out + g1d[p + d] * _neighbor_sum(acc, d, axis=0)

    o_ref[0] = out[HB:HB + TH, :W]


# ----------------------------------------------------------------------------
# Wrapper
# ----------------------------------------------------------------------------
def boundary_generator(seg_map, *, kernel_size=1, ignore_index=None,
                       tile_rows=None):
    """JAX/Pallas equivalent of BoundaryGenerator(...).forward(seg_map)."""
    # TODO(synk): even kernel_size changes the conv output size in PyTorch
    # ((H+1, W+1)); only odd kernel_size (including the default 1) is supported.
    assert kernel_size >= 1 and kernel_size % 2 == 1, \
        "only odd kernel_size is supported"

    x = seg_map
    if x.ndim == 4:
        assert x.shape[1] == 1, "BoundaryGenerator expects single-channel maps"
        x = x.reshape(x.shape[0], x.shape[2], x.shape[3])   # free (bitcast)
    assert x.ndim == 3, "seg_map must be (B, H, W) or (B, 1, H, W)"
    B, H, W = x.shape

    # Keep the seg map in its native 32-bit dtype (f32/int32/uint32) and cast
    # to f32 inside the kernel -- saves a full HBM round trip.
    if x.dtype.itemsize != 4:
        # TODO(synk): sub-32-bit seg maps are upcast in the wrapper (one extra
        # HBM pass); they could be read natively with 16/32-sublane tiles.
        x = x.astype(jnp.float32)

    p = kernel_size // 2
    HB = _round_up(p + 1, 8)              # halo rows; HB >= p+1 is load-bearing
    assert HB >= p + 1

    # Lane-dense width.  Only pad when W is not already a multiple of 128
    # (kernel_size > 1 additionally needs >= p zero columns on the right so the
    # Gaussian's cyclic lane rolls wrap into padding).
    if kernel_size == 1 and W % 128 == 0:
        Wb = W
        xw = x                            # no wrapper pad, no extra HBM pass
    else:
        Wb = _round_up(W + (p if kernel_size > 1 else 0), 128)
        xw = jnp.pad(x, ((0, 0), (0, 0), (0, Wb - W)))

    # ---- strip height (TH) --------------------------------------------------
    if tile_rows is None:
        target_bytes = 2_500_000          # ~2.5 MB per strip block (f32)
        TH = max(HB, (target_bytes // (4 * Wb)) // HB * HB)
        TH = min(TH, 1024)                # keeps v7x (64 MiB VMEM/TC) safe
        TH = min(TH, _round_up(H, HB))
        TH = max(TH, HB)
        # Keep a few grid steps alive so both v7x TensorCores get work.
        while B * _cdiv(H, TH) < 4 and TH > HB:
            TH = max(HB, _round_up(_cdiv(TH, 2), HB))
    else:
        TH = max(HB, _round_up(tile_rows, HB))
    assert TH % HB == 0
    S = _cdiv(H, TH)
    r = TH // HB                          # strip height in halo blocks
    nhb = _cdiv(H, HB)                    # halo blocks along H

    if kernel_size == 1:
        kernel = functools.partial(
            _boundary_k1_kernel, TH=TH, HB=HB, H=H, W=W, Wb=Wb,
            ignore_index=ignore_index)
        scratch = []
    else:
        kernel = functools.partial(
            _boundary_gauss_kernel, TH=TH, HB=HB, H=H, W=W, ksize=kernel_size,
            g1d=_gauss_sep_coeffs(kernel_size), ignore_index=ignore_index)
        scratch = [pltpu.VMEM((TH + 2 * HB, Wb), jnp.float32)]

    # Explicit VMEM budget: double-buffered mid + halos + out (+ slab), with
    # 2x headroom; clamped to 48 MiB so it fits v7x's 64 MiB per TensorCore.
    vmem_need = (2 * TH * Wb * 4 + 4 * HB * Wb * 4 + 2 * TH * W * 4
                 + (TH + 2 * HB) * Wb * 4 * int(kernel_size > 1))
    vmem_limit = int(min(48 * 2 ** 20, max(32 * 2 ** 20, 2 * vmem_need)))

    out = pl.pallas_call(
        kernel,
        out_shape=jax.ShapeDtypeStruct((B, H, W), jnp.float32),
        grid_spec=pltpu.PrefetchScalarGridSpec(
            num_scalar_prefetch=0,
            grid=(B, S),
            in_specs=[
                # current strip (may overhang H on the last step -> masked)
                pl.BlockSpec((1, TH, Wb), lambda b, s: (b, s, 0)),
                # halo block just above (clamped; zeroed in-kernel when s == 0)
                pl.BlockSpec((1, HB, Wb),
                             lambda b, s: (b, jnp.maximum(s * r - 1, 0), 0)),
                # halo block just below (clamped; zeroed in-kernel at bottom)
                pl.BlockSpec((1, HB, Wb),
                             lambda b, s: (b, jnp.minimum((s + 1) * r,
                                                          nhb - 1), 0)),
            ],
            out_specs=pl.BlockSpec((1, TH, W), lambda b, s: (b, s, 0)),
            scratch_shapes=scratch,
        ),
        compiler_params=pltpu.CompilerParams(
            dimension_semantics=("parallel", "parallel"),
            vmem_limit_bytes=vmem_limit),
    )(xw, xw, xw)

    # NCHW, matching PyTorch; adding the unit channel dim is a free reshape.
    return out.reshape(B, 1, H, W)


# ----------------------------------------------------------------------------
# Pure numpy reference (mirrors the PyTorch module) for self-checking.
# ----------------------------------------------------------------------------
def _numpy_reference(seg_map, kernel_size=1, ignore_index=None):
    x = np.asarray(seg_map, dtype=np.float32)
    if x.ndim == 3:
        x = x[:, None]
    if ignore_index is not None:
        x = np.where(x == ignore_index, 255.0, x).astype(np.float32)
    b_k = np.ones((3, 3), np.float32)
    b_k[1, 1] = -8.0
    g_k = gauss_np(kernel_size, 2.0 / kernel_size).astype(np.float32)

    def conv2d(img, k, pad):
        kh, kw = k.shape
        xp = np.pad(img, ((pad, pad), (pad, pad)))
        H, W = img.shape
        out = np.zeros((H, W), np.float32)
        for i in range(kh):
            for j in range(kw):
                out += k[i, j] * xp[i:i + H, j:j + W]
        return out

    B, _, H, W = x.shape
    out = np.zeros_like(x)
    for b in range(B):
        y = np.abs(conv2d(x[b, 0], b_k, 1))
        if ignore_index is not None:
            y = np.where(y >= 200.0, 0.0, y)
        y = np.where(y > 0.0, 1.0, 0.0).astype(np.float32)
        out[b, 0] = conv2d(y, g_k, kernel_size // 2)
    return out


if __name__ == "__main__":
    key = jax.random.PRNGKey(0)
    k1, k2, k3, k4 = jax.random.split(key, 4)

    # T1: default config, native int32 seg map (in-kernel cast), 128-aligned
    #     width (no wrapper pad / crop), partial last strip (H % TH != 0).
    seg1 = jax.random.randint(k1, (2, 52, 128), 0, 4, dtype=jnp.int32)
    out1 = jax.block_until_ready(boundary_generator(seg1))
    assert out1.shape == (2, 1, 52, 128)
    ref1 = _numpy_reference(np.asarray(seg1), 1, None)
    np.testing.assert_allclose(np.asarray(out1), ref1, rtol=1e-5, atol=1e-5)

    # T2: kernel_size=3 + ignore_index (slab / separable-Gaussian path),
    #     unaligned width -> lane padding, partial last strip.
    seg2 = jax.random.randint(k2, (2, 40, 48), 0, 4).astype(jnp.float32)
    out2 = jax.block_until_ready(
        boundary_generator(seg2, kernel_size=3, ignore_index=3))
    ref2 = _numpy_reference(np.asarray(seg2), 3, 3)
    np.testing.assert_allclose(np.asarray(out2), ref2, rtol=1e-5, atol=1e-5)

    # T3: B=1, aligned width, explicit tile_rows -> 3 strips so the interior
    #     strip has real halos on both sides.
    seg3 = jax.random.randint(k3, (1, 96, 256), 0, 5).astype(jnp.float32)
    out3 = jax.block_until_ready(boundary_generator(seg3, tile_rows=32))
    ref3 = _numpy_reference(np.asarray(seg3), 1, None)
    np.testing.assert_allclose(np.asarray(out3), ref3, rtol=1e-5, atol=1e-5)

    # T4: default kernel_size with ignore_index=0 and an unaligned width
    #     (ignore-guard on the zero lane-padding columns), 4-D NCHW input.
    seg4 = jax.random.randint(k4, (2, 33, 72), 0, 4).astype(jnp.float32)[:, None]
    out4 = jax.block_until_ready(boundary_generator(seg4, ignore_index=0))
    ref4 = _numpy_reference(np.asarray(seg4), 1, 0)
    np.testing.assert_allclose(np.asarray(out4), ref4, rtol=1e-5, atol=1e-5)

    print("KERNEL_OK")
</pallas_src>

<mosaic_0001>
module attributes {stable_mosaic.version = 11 : i64} {
  func.func @_boundary_k1_kernel(%arg0: i32, %arg1: i32, %arg2: memref<1x32x128xi32, #tpu.memory_space<vmem>>, %arg3: memref<1x8x128xi32, #tpu.memory_space<vmem>>, %arg4: memref<1x8x128xi32, #tpu.memory_space<vmem>>, %arg5: memref<1x32x128xf32, #tpu.memory_space<vmem>>) attributes {dimension_semantics = [#tpu.dimension_semantics<parallel>, #tpu.dimension_semantics<parallel>], iteration_bounds = array<i64: 2, 2>, scalar_prefetch = 0 : i64, scratch_operands = 0 : i64, tpu.core_type = #tpu.core_type<tc>, window_params = [{transform_indices = @transform_0, window_bounds = array<i64: 1, 32, 128>}, {transform_indices = @transform_1, window_bounds = array<i64: 1, 8, 128>}, {transform_indices = @transform_2, window_bounds = array<i64: 1, 8, 128>}, {transform_indices = @transform_3, window_bounds = array<i64: 1, 32, 128>}]} {
    %c0 = arith.constant 0 : index
    %c0_0 = arith.constant 0 : index
    %c0_1 = arith.constant 0 : index
    %0 = vector.load %arg2[%c0, %c0_0, %c0_1] : memref<1x32x128xi32, #tpu.memory_space<vmem>>, vector<1x32x128xi32>
    %1 = vector.shape_cast %0 : vector<1x32x128xi32> to vector<32x128xi32>
    %2 = arith.sitofp %1 : vector<32x128xi32> to vector<32x128xf32>
    %3 = tpu.iota {dimensions = array<i32: 0>} : vector<32x128xi32>
    %c32_i32 = arith.constant 32 : i32
    %4 = arith.muli %arg1, %c32_i32 : i32
    %c52_i32 = arith.constant 52 : i32
    %5 = arith.subi %c52_i32, %4 : i32
    %6 = vector.broadcast %5 : i32 to vector<32x128xi32>
    %7 = arith.cmpi slt, %3, %6 : vector<32x128xi32>
    %cst = arith.constant 0.000000e+00 : f32
    %8 = vector.broadcast %cst : f32 to vector<32x128xf32>
    %9 = arith.select %7, %2, %8 : vector<32x128xi1>, vector<32x128xf32>
    %c0_2 = arith.constant 0 : index
    %c7 = arith.constant 7 : index
    %c0_3 = arith.constant 0 : index
    %10 = vector.load %arg3[%c0_2, %c7, %c0_3] : memref<1x8x128xi32, #tpu.memory_space<vmem>>, vector<1x1x128xi32>
    %11 = vector.shape_cast %10 : vector<1x1x128xi32> to vector<1x128xi32>
    %12 = arith.sitofp %11 : vector<1x128xi32> to vector<1x128xf32>
    %c0_4 = arith.constant 0 : index
    %c0_5 = arith.constant 0 : index
    %c0_6 = arith.constant 0 : index
    %13 = vector.load %arg4[%c0_4, %c0_5, %c0_6] : memref<1x8x128xi32, #tpu.memory_space<vmem>>, vector<1x1x128xi32>
    %14 = vector.shape_cast %13 : vector<1x1x128xi32> to vector<1x128xi32>
    %15 = arith.sitofp %14 : vector<1x128xi32> to vector<1x128xf32>
    %c0_i32 = arith.constant 0 : i32
    %16 = arith.cmpi sgt, %arg1, %c0_i32 : i32
    %cst_7 = arith.constant 0.000000e+00 : f32
    %17 = vector.broadcast %cst_7 : f32 to vector<1x128xf32>
    %18 = arith.select %16, %12, %17 : vector<1x128xf32>
    %c1_i32 = arith.constant 1 : i32
    %19 = arith.addi %arg1, %c1_i32 : i32
    %c32_i32_8 = arith.constant 32 : i32
    %20 = arith.muli %19, %c32_i32_8 : i32
    %c52_i32_9 = arith.constant 52 : i32
    %21 = arith.cmpi slt, %20, %c52_i32_9 : i32
    %cst_10 = arith.constant 0.000000e+00 : f32
    %22 = vector.broadcast %cst_10 : f32 to vector<1x128xf32>
    %23 = arith.select %21, %15, %22 : vector<1x128xf32>
    %c1_i32_11 = arith.constant 1 : i32
    %24 = tpu.dynamic_rotate %9 by %c1_i32_11 dim 0 : vector<32x128xf32>, i32 -> vector<32x128xf32>
    %c31_i32 = arith.constant 31 : i32
    %25 = tpu.dynamic_rotate %9 by %c31_i32 dim 0 : vector<32x128xf32>, i32 -> vector<32x128xf32>
    %c0_i32_12 = arith.constant 0 : i32
    %26 = vector.broadcast %c0_i32_12 : i32 to vector<32x128xi32>
    %27 = arith.cmpi eq, %3, %26 : vector<32x128xi32>
    %28 = vector.shape_cast %18 : vector<1x128xf32> to vector<1x128xf32>
    %29 = vector.broadcast %28 : vector<1x128xf32> to vector<32x128xf32>
    %30 = arith.select %27, %29, %24 : vector<32x128xi1>, vector<32x128xf32>
    %c31_i32_13 = arith.constant 31 : i32
    %31 = vector.broadcast %c31_i32_13 : i32 to vector<32x128xi32>
    %32 = arith.cmpi eq, %3, %31 : vector<32x128xi32>
    %33 = vector.shape_cast %23 : vector<1x128xf32> to vector<1x128xf32>
    %34 = vector.broadcast %33 : vector<1x128xf32> to vector<32x128xf32>
    %35 = arith.select %32, %34, %25 : vector<32x128xi1>, vector<32x128xf32>
    %36 = arith.addf %9, %30 : vector<32x128xf32>
    %37 = arith.addf %36, %35 : vector<32x128xf32>
    %c1_i32_14 = arith.constant 1 : i32
    %38 = tpu.dynamic_rotate %37 by %c1_i32_14 dim 1 : vector<32x128xf32>, i32 -> vector<32x128xf32>
    %c127_i32 = arith.constant 127 : i32
    %39 = tpu.dynamic_rotate %37 by %c127_i32 dim 1 : vector<32x128xf32>, i32 -> vector<32x128xf32>
    %40 = tpu.iota {dimensions = array<i32: 1>} : vector<32x128xi32>
    %c0_i32_15 = arith.constant 0 : i32
    %41 = vector.broadcast %c0_i32_15 : i32 to vector<32x128xi32>
    %42 = arith.cmpi eq, %40, %41 : vector<32x128xi32>
    %cst_16 = arith.constant 0.000000e+00 : f32
    %43 = vector.broadcast %cst_16 : f32 to vector<32x128xf32>
    %44 = arith.select %42, %43, %38 : vector<32x128xi1>, vector<32x128xf32>
    %c127_i32_17 = arith.constant 127 : i32
    %45 = vector.broadcast %c127_i32_17 : i32 to vector<32x128xi32>
    %46 = arith.cmpi eq, %40, %45 : vector<32x128xi32>
    %cst_18 = arith.constant 0.000000e+00 : f32
    %47 = vector.broadcast %cst_18 : f32 to vector<32x128xf32>
    %48 = arith.select %46, %47, %39 : vector<32x128xi1>, vector<32x128xf32>
    %49 = arith.addf %37, %44 : vector<32x128xf32>
    %50 = arith.addf %49, %48 : vector<32x128xf32>
    %cst_19 = arith.constant 9.000000e+00 : f32
    %51 = vector.broadcast %cst_19 : f32 to vector<32x128xf32>
    %52 = arith.mulf %51, %9 : vector<32x128xf32>
    %53 = arith.subf %50, %52 : vector<32x128xf32>
    %54 = math.absf %53 : vector<32x128xf32>
    %cst_20 = arith.constant 0.000000e+00 : f32
    %55 = vector.broadcast %cst_20 : f32 to vector<32x128xf32>
    %56 = arith.cmpf ogt, %54, %55 : vector<32x128xf32>
    %cst_21 = arith.constant 1.000000e+00 : f32
    %cst_22 = arith.constant 0.000000e+00 : f32
    %57 = vector.broadcast %cst_21 : f32 to vector<32x128xf32>
    %58 = vector.broadcast %cst_22 : f32 to vector<32x128xf32>
    %59 = arith.select %56, %57, %58 : vector<32x128xi1>, vector<32x128xf32>
    %c0_23 = arith.constant 0 : index
    %c0_24 = arith.constant 0 : index
    %c0_25 = arith.constant 0 : index
    %60 = vector.load %arg5[%c0_23, %c0_24, %c0_25] : memref<1x32x128xf32, #tpu.memory_space<vmem>>, vector<1x32x128xf32>
    %61 = vector.shape_cast %60 : vector<1x32x128xf32> to vector<32x128xf32>
    %62 = vector.shape_cast %59 : vector<32x128xf32> to vector<1x32x128xf32>
    tpu.vector_store %arg5[%c0_23, %c0_24, %c0_25], %62 {strides = array<i32>} : memref<1x32x128xf32, #tpu.memory_space<vmem>>, vector<1x32x128xf32>,
    return
  }
  func.func @transform_0(%arg0: i32, %arg1: i32) -> (i32, i32, i32) {
    %c0_i32 = arith.constant 0 : i32
    %c0_i32_0 = arith.constant 0 : i32
    return %arg0, %arg1, %c0_i32 : i32, i32, i32
  }
  func.func @transform_1(%arg0: i32, %arg1: i32) -> (i32, i32, i32) {
    %c4_i32 = arith.constant 4 : i32
    %0 = arith.muli %arg1, %c4_i32 : i32
    %c1_i32 = arith.constant 1 : i32
    %1 = arith.subi %0, %c1_i32 : i32
    %c0_i32 = arith.constant 0 : i32
    %2 = arith.maxsi %1, %c0_i32 : i32
    %c0_i32_0 = arith.constant 0 : i32
    %c0_i32_1 = arith.constant 0 : i32
    return %arg0, %2, %c0_i32_0 : i32, i32, i32
  }
  func.func @transform_2(%arg0: i32, %arg1: i32) -> (i32, i32, i32) {
    %c1_i32 = arith.constant 1 : i32
    %0 = arith.addi %arg1, %c1_i32 : i32
    %c4_i32 = arith.constant 4 : i32
    %1 = arith.muli %0, %c4_i32 : i32
    %c6_i32 = arith.constant 6 : i32
    %2 = arith.minsi %1, %c6_i32 : i32
    %c0_i32 = arith.constant 0 : i32
    %c0_i32_0 = arith.constant 0 : i32
    return %arg0, %2, %c0_i32 : i32, i32, i32
  }
  func.func @transform_3(%arg0: i32, %arg1: i32) -> (i32, i32, i32) {
    %c0_i32 = arith.constant 0 : i32
    %c0_i32_0 = arith.constant 0 : i32
    return %arg0, %arg1, %c0_i32 : i32, i32, i32
  }
}

</mosaic_0001>

<bundles_post_ra>
// kernel: tpu_custom_call.1
= control target key start
LH: loop header
LB: loop body
LE: loop exit
PB: predicated region body
PF: predicated region fallthrough
CT: control target
= control target key end

     0   :  { %s1100_s12 = smov 0   ;;  %s1102_s13 = smov 0   ;;  %s1350_s0 = inlined_call_operand.vmem [shape: s32[2,52,128], index: 0, kind: input, shape index: {}]   ;;  %s1351_s1 = inlined_call_operand.vmem [shape: s32[2,52,128], index: 1, kind: input, shape index: {}]   ;;  %s1352_s2 = inlined_call_operand.vmem [shape: s32[2,52,128], index: 2, kind: input, shape index: {}]   ;;  %s1353_s3 = inlined_call_operand.vmem [shape: f32[2,52,128], index: 3, kind: output, shape index: {}]  }
   0x1   :  { %s1104_s14 = smov 0   ;;  %s1106_s15 = smov 0  }
   0x2   :  { %s1108_s16 = smov 0   ;;  %s1110_s17 = smov 0  }
   0x3   :  { %s1112_s18 = smov 0  }
   0x4 LB: > { %s22_s19 = sadd.s32 1, %s1035_s16  ;;  %s25_s20 = sadd.s32 1, %s1039_s17  ;;  %s1043_s18 = sphi %s1112_s18, %s13_s18   ;;  %s1039_s17 = sphi %s1110_s17, %s1364_s17   ;;  %s1035_s16 = sphi %s1108_s16, %s1363_s16   ;;  %s1031_s15 = sphi %s1106_s15, %s1362_s15   ;;  %s1027_s14 = sphi %s1104_s14, %s1361_s14   ;;  %s1023_s13 = sphi %s1102_s13, %s1360_s13   ;;  %s1019_s12 = sphi %s1100_s12, %s1359_s12  }
   0x5   : > { %p23_p0 = scmp.ge.s32.totalorder %s22_s19, 2  ;;  %s774_s21 = sadd.s32 4294967295, %s1043_s18  }
   0x6   : > { %p144_p1 = scmp.ne.s32.totalorder %s1023_s13, %s1019_s12  ;;  %p145_p2 = scmp.eq.s32.totalorder %s774_s21, 3 }
   0x7   : > { %s1366_s19 = smov (%p23_p0, %s22_s19), 0  ;;  %s1368_s20 = smov (!%p23_p0, %s25_s20), %s1039_s17 }
   0x8   : > { %s130_s22 = ssub.s32 %s1035_s16, %s1366_s19  ;;  %p27_p3 = scmp.ge.s32.totalorder %s1368_s20, 2 }
   0x9   : > { %p784_p4 = scmp.ge.s32.totalorder %s1043_s18, 1  ;;  %p1146_p5 = por %p145_p2, %p144_p1 }
   0xa   : > { %p228_p6 = scmp.lt.s32.totalorder %s1043_s18, 5  ;;  %s1370_s20 = smov (%p27_p3, %s1368_s20), 0 }
   0xb   : > { %s129_s24 = ssub.s32 %s1039_s17, %s1370_s20  ;;  %s134_s26 = sadd.s32 1, %s1023_s13 }
   0xc   : > { %p229_p7 = pnand %p784_p4, %p228_p6  ;;  %s131_s25 = sor.u32 %s130_s22, %s129_s24 }
   0xd   : > { %p132_p8 = scmp.eq.s32.totalorder %s131_s25, 0  ;;  %s1160_s28 = sshll.u32 (!%p229_p7), %s1027_s14, 2 }
   0xe   : > { %232 = sbr.rel (%p229_p7) target bundleno = 219 (0xdb), region = 32  ;;  %p288_p9 = scmp.lt.s32.totalorder (!%p229_p7), %s1031_s15, 1 }
   0xf   : > { %s1157_s27 = scalar_select %p132_p8, %s1023_s13, %s134_s26  }
  0x10   : > { %p290_p10 = scmp.lt.s32.totalorder (!%p229_p7), %s1160_s28, 6  ;;  %s801_s29 = sshll.u32 (!%p229_p7), %s1027_s14, 5 }
  0x11   : > { %s352_s6 = ssub.s32 (!%p229_p7), 52, %s801_s29  ;;  %s827_s7 = sadd.s32 (!%p229_p7), 4, %s1160_s28 }
  0x12   : > { %p1179_p11 = scmp.lt.s32.totalorder (!%p229_p7), %s827_s7, 6  ;;  %s829_s11 = sadd.s32 (!%p229_p7), 32, %s801_s29 }
  0x13   : > { %v346_v0 = vlaneseq  ;;  %s289_s30 = scalar_select %p288_p9, %s1031_s15, 1  ;;  %v353_v5 = vstv %s352_s6 }
  0x14   : > { %s291_s4 = scalar_select %p290_p10, %s1160_s28, 6 }
  0x15   : > { %v1167_v1 = vshrl.u32 %v346_v0, 7  ;;  %s1170_s5 = smul.u32 7, %s289_s30  ;;  %p373_p12 = scmp.lt.s32.totalorder %s829_s11, 52  ;;  %v445_v55 = vand.u32 127, %v346_v0 }
  0x16   : > { %s1372_s7 = smov (!%p1179_p11, %s827_s7), 6  ;;  %s1204_s26 = sadd.s32 4294967295, %s1160_s28 }
  0x17   : > { %v348_v2 = vadd.s32 8, %v1167_v1  ;;  %v349_v3 = vadd.s32 16, %v1167_v1  ;;  %v1175_v4 = vadd.s32 24, %v1167_v1  ;;  %s293_s8 = sadd.s32 %s1170_s5, %s291_s4  ;;  %vm382_vm3 = vcmp.lt.s32.totalorder %v1167_v1, 1  ;;  %s1374_s7 = smov (!%p1179_p11, %s1372_s7), 6 }
  0x18   : > { %s787_s10 = sshll.u32 %s293_s8, 3  ;;  %vm391_vm4 = vcmp.lt.s32.totalorder %v1167_v1, 7  ;;  %vm354_vm5 = vcmp.lt.s32.totalorder %v1167_v1, %v353_v5  ;;  %p366_p13 = scmp.gt.s32.totalorder %s1027_s14, 0  ;;  %v402_v37 = vsub.s32 0, %v1167_v1  ;;  %vm396_vm9 = vcmp.eq.s32.totalorder %v1167_v1, 0 }
  0x19   : > { %s295_s24 = scalar_lea.vmem %s1350_s0, %s787_s10  ;;  %vm355_vm0 = vcmp.lt.s32.totalorder %v348_v2, %v353_v5  ;;  %vm356_vm1 = vcmp.lt.s32.totalorder %v349_v3, %v353_v5  ;;  %vm357_vm2 = vcmp.lt.s32.totalorder %v1175_v4, %v353_v5  ;;  %s326_s29 = sadd.s32 %s1170_s5, %s1374_s7  ;;  %vm411_vm7 = vcmp.eq.s32.totalorder %v1175_v4, 31 }
  0x1a   : > { %v339_v6 = vld [vmem:[%s295_s24 + $0x8] sm:$0xff]  ;;  %v340_v7 = vld [vmem:[%s295_s24 + $0x10] sm:$0xff]  ;;  %v341_v8 = vld [vmem:[%s295_s24 + $0x18] sm:$0xff]  ;;  %s1189_s25 = scalar_select %p373_p12, 1, 0  ;;  %vm446_vm10 = vcmp.eq.s32.totalorder %v445_v55, 0 }
  0x1b   : > { %v343_v9 = vcvt.s32.f32 %v339_v6  ;;  %v344_v10 = vcvt.s32.f32 %v340_v7  ;;  %v345_v11 = vcvt.s32.f32 %v341_v8  ;;  %v338_v12 = vld [vmem:[%s295_s24] sm:$0xff]  ;;  %p303_p0 = scmp.gt.s32.totalorder %s1204_s26, 0  ;;  %s800_s30 = sshll.u32 %s326_s29, 3  ;;  %vm451_vm11 = vcmp.eq.s32.totalorder %v445_v55, 127 }
  0x1c   : > { %v342_v13 = vcvt.s32.f32 %v338_v12  ;;  %v375_v17 = vstv %s1189_s25  ;;  %p790_p1 = scmp.lt.s32.totalorder %s1204_s26, 6  ;;  %s328_s7 = scalar_lea.vmem %s1352_s2, %s800_s30 }
  0x1d   : > { %v1196_v14 = vsel %vm355_vm0, %v343_v9, 0.0  ;;  %v1198_v15 = vsel %vm356_vm1, %v344_v10, 0.0  ;;  %v1200_v16 = vsel %vm357_vm2, %v345_v11, 0.0  ;;  %v364_v30 = vld [vmem:[%s328_s7] sm:$0x1]  ;;  %vm376_vm6 = vcmp.eq.s32.totalorder %v375_v17, 1 }
  0x1e   : > { %v379_v18 = vrot.slane %v1196_v14, 7  ;;  %v380_v19 = vrot.slane %v1198_v15, 7  ;;  %v389_v20 = vrot.slane %v1198_v15, 1  ;;  %v390_v21 = vrot.slane %v1200_v16, 1  ;;  %s304_s8 = scalar_select %p303_p0, %s1204_s26, 0 }
  0x1f   : > { %v1213_v22 = vsel %vm354_vm5, %v342_v13, 0.0  ;;  %v388_v23 = vrot.slane %v1196_v14, 1  ;;  %v381_v24 = vrot.slane %v1200_v16, 7  ;;  %v365_v34 = vcvt.s32.f32 %v364_v30  ;;  %s367_s9 = scalar_select %p366_p13, 1, 0 }
  0x20   : > { %v384_v25 = vsel %vm382_vm3, %v379_v18, %v380_v19  ;;  %v392_v26 = vsel %vm391_vm4, %v389_v20, %v390_v21  ;;  %v378_v27 = vrot.slane %v1213_v22, 7  ;;  %v387_v28 = vrot.slane %v1213_v22, 1  ;;  %s1376_s8 = smov (!%p790_p1, %s304_s8), 6  ;;  %s1077_s10 = smov 1  }
  0x21   : > { %v422_v29 = vadd.f32 %v384_v25, %v1198_v15  ;;  %v383_v31 = vsel %vm382_vm3, %v380_v19, %v381_v24  ;;  %v393_v33 = vsel %vm391_vm4, %v388_v23, %v389_v20  ;;  %v377_v38 = vsel %vm376_vm6, %v365_v34, 0.0  ;;  %s310_s14 = sadd.s32 %s1170_s5, %s1376_s8  ;;  %s1078_s5 = smov 127  }
  0x22   : > { %v385_v32 = vsel %vm382_vm3, %v378_v27, %v379_v18  ;;  %v395_v39 = vsel %vm391_vm4, %v390_v21, %v387_v28  ;;  %v423_v40 = vadd.f32 %v383_v31, %v1200_v16  ;;  %v415_v42 = vrot.slane %v377_v38, %v402_v37  ;;  %s795_s11 = sshll.u32 %s310_s14, 3  ;;  %s280_s25 = sand.u32 1, %s1019_s12  }
  0x23   : > { %v1239_v35 = vadd.f32 %v422_v29, %v392_v26  ;;  %v421_v36 = vadd.f32 %v385_v32, %v1196_v14  ;;  %v368_v43 = vstv %s367_s9  ;;  %s312_s24 = scalar_lea.vmem %s1351_s1, %s795_s11  ;;  %v386_v49 = vsel %vm382_vm3, %v381_v24, %v378_v27  ;;  %s785_s26 = sshll.u32 %s280_s25, 5 }
  0x24   : > { %v419_v44 = vsel %vm411_vm7, %v415_v42, %v395_v39  ;;  %v362_v46 = vld [vmem:[%s312_s24 + $0x7] sm:$0x1]  ;;  %vm369_vm8 = vcmp.eq.s32.totalorder %v368_v43, 1  ;;  %v394_v51 = vsel %vm391_vm4, %v387_v28, %v388_v23  ;;  %v465_v61 = vmul.f32 9.0, %v1196_v14  ;;  %s1272_s12 = scalar_lea.vmem [#allocation2], %s785_s26   ;;  %s496_s29 = ssub.s32 (%p1146_p5), 7, %s1160_s28 }
  0x25   : > { %432 = vrot.lane.b32.xlu1 %v1239_v35, %s1077_s10  ;;  %v425_v41 = vadd.f32 %v421_v36, %v393_v33  ;;  %v427_v45 = vadd.f32 %v423_v40, %v419_v44  ;;  %v363_v47 = vcvt.s32.f32 %v362_v46  ;;  %v467_v4 = vmul.f32 9.0, %v1200_v16  ;;  %s833_s30 = smul.u32 (%p1146_p5), 7, %s1031_s15  ;;  %p497_p2 = scmp.lt.s32.totalorder (%p1146_p5), %s496_s29, 4 }
  0x26   : > { %v1079_v13 = vmov 0.0   ;;  %v464_v17 = vmul.f32 9.0, %v1213_v22 }
  0x27   : > { %430 = vrot.lane.b32.xlu0 %v425_v41, %s1077_s10  ;;  %v370_v48 = vsel %vm369_vm8, %v363_v47, 0.0  ;;  %s502_s4 = sadd.s32 (%p1146_p5), %s833_s30, %s1160_s28 }
  0x28   : > { %v403_v50 = vrot.slane %v370_v48, %v402_v37  ;;  %s807_s6 = sshll.u32 (%p1146_p5), %s502_s4, 3 }
  0x29   : > { %434 = vrot.lane.b32.xlu1 %v427_v45, %s1077_s10 }
  0x2a   : > { %v404_v52 = vsel %vm396_vm9, %v403_v50, %v386_v49 }
  0x2b   : > { %v420_v53 = vadd.f32 %v404_v52, %v1213_v22  ;;  %v466_v22 = vmul.f32 9.0, %v1198_v15 }
  0x2d   : > { %438 = vrot.lane.b32.xlu1 %v425_v41, %s1078_s5  ;;  %v424_v54 = vadd.f32 %v420_v53, %v394_v51 }
  0x2f   : > { %428 = vrot.lane.b32.xlu0 %v424_v54, %s1077_s10  ;;  %s1293_s10 = scalar_lea.vmem (%p1146_p5), %s1353_s3, %s807_s6  }
  0x31   : > { %442 = vrot.lane.b32.xlu1 %v427_v45, %s1078_s5 }
  0x33   : > { %436 = vrot.lane.b32.xlu0 %v424_v54, %s1078_s5 }
  0x37   : > { %440 = vrot.lane.b32.xlu0 %v1239_v35, %s1078_s5 }
  0x97   : > { %v433_v56 = vpop.permute.xlu1 %432 }
  0x98   : > { %v449_v19 = vsel %vm446_vm10, 0.0, %v433_v56 }
  0x99   : > { %v431_v57 = vpop.permute.xlu0 %430  ;;  %v458_v23 = vadd.f32 %v449_v19, %v1239_v35 }
  0x9a   : > { %v448_v59 = vsel %vm446_vm10, 0.0, %v431_v57 }
  0x9b   : > { %v435_v58 = vpop.permute.xlu1 %434  ;;  %v457_v60 = vadd.f32 %v448_v59, %v425_v41 }
  0x9c   : > { %v450_v63 = vsel %vm446_vm10, 0.0, %v435_v58 }
  0x9d   : > { %v459_v3 = vadd.f32 %v450_v63, %v427_v45 }
  0x9f   : > { %v439_v62 = vpop.permute.xlu1 %438 }
  0xa0   : > { %v453_v1 = vsel %vm451_vm11, 0.0, %v439_v62 }
  0xa1   : > { %v461_v2 = vadd.f32 %v457_v60, %v453_v1  ;;  %v429_v6 = vpop.permute.xlu0 %428 }
  0xa2   : > { %v447_v8 = vsel %vm446_vm10, 0.0, %v429_v6 }
  0xa3   : > { %v469_v0 = vsub.f32 %v461_v2, %v465_v61  ;;  %v443_v5 = vpop.permute.xlu1 %442  ;;  %v456_v12 = vadd.f32 %v447_v8, %v424_v54 }
  0xa4   : > { %v455_v7 = vsel %vm451_vm11, 0.0, %v443_v5 }
  0xa5   : > { %v473_v9 = vand.u32 2147483647, %v469_v0  ;;  %v463_v10 = vadd.f32 %v459_v3, %v455_v7  ;;  %v437_v18 = vpop.permute.xlu0 %436 }
  0xa6   : > { %v452_v16 = vsel %vm451_vm11, 0.0, %v437_v18 }
  0xa7   : > { %vm477_vm12 = vcmp.gt.f32.partialorder %v473_v9, 0.0  ;;  %v471_v11 = vsub.f32 %v463_v10, %v467_v4  ;;  %v460_v21 = vadd.f32 %v456_v12, %v452_v16 }
  0xa8   : > { %v481_v14 = vsel %vm477_vm12, 1.0, %v1079_v13 }
  0xa9   : > { %485 = vst [vmem:[%s1272_s12 + $0x8] sm:$0xff] %v481_v14  ;;  %v475_v20 = vand.u32 2147483647, %v471_v11  ;;  %v468_v24 = vsub.f32 %v460_v21, %v464_v17  ;;  %v441_v26 = vpop.permute.xlu0 %440 }
  0xaa   : > { %v454_v27 = vsel %vm451_vm11, 0.0, %v441_v26 }
  0xab   : > { %vm479_vm13 = vcmp.gt.f32.partialorder %v475_v20, 0.0  ;;  %v472_v28 = vand.u32 2147483647, %v468_v24  ;;  %v462_v29 = vadd.f32 %v458_v23, %v454_v27 }
  0xac   : > { %v483_v25 = vsel %vm479_vm13, 1.0, %v1079_v13 }
  0xad   : > { %487 = vst [vmem:[%s1272_s12 + $0x18] sm:$0xff] %v483_v25  ;;  %vm476_vm14 = vcmp.gt.f32.partialorder %v472_v28, 0.0  ;;  %v470_v30 = vsub.f32 %v462_v29, %v466_v22 }
  0xae   : > { %v480_v31 = vsel %vm476_vm14, 1.0, %v1079_v13 }
  0xaf   : > { %484 = vst [vmem:[%s1272_s12] sm:$0xff] %v480_v31  ;;  %v474_v32 = vand.u32 2147483647, %v470_v30  ;;  %494 = sbr.rel (!%p1146_p5) target bundleno = 219 (0xdb), region = 36 }
  0xb1   : > { %vm478_vm15 = vcmp.gt.f32.partialorder %v474_v32, 0.0 }
  0xb2   : > { %v482_v33 = vsel %vm478_vm15, 1.0, %v1079_v13 }
  0xb3   : > { %486 = vst [vmem:[%s1272_s12 + $0x10] sm:$0xff] %v482_v33 }
  0xb4   : > { %s1378_s29 = smov (!%p497_p2, %s496_s29), 4 }
  0xb5   : > { %s805_s7 = sshll.u32 %s1378_s29, 7 }
  0xb6   : > { %p808_p3 = scmp.eq.s32.totalorder %s805_s7, 0 }
  0xb7   : > { %s1296_s23 = sshrl.u32 (!%p808_p3), %s1378_s29, 2 }
  0xb8   : > { %507 = sbr.rel (%p808_p3) target bundleno = 219 (0xdb), region = 40  ;;  %p809_p4 = scmp.le.s32.totalorder (!%p808_p3), %s1296_s23, 0 }
  0xbd   : > { %707 = sbr.rel (%p809_p4) target bundleno = 202 (0xca), region = 122  ;;  %s1356_s15 = smov (!%p809_p4), %s1293_s10 }
  0xbe   : > { %s1357_s28 = smov (!%p809_p4), %s1272_s12  ;;  %s1305_s14 = smov (!%p809_p4), 0  }
  0xbf   : > { %s1057_s11 = smov (!%p809_p4), 0  }
  0xc2 LB: >> { %v576_v15 = vld [vmem:[%s1051_s28] sm:$0xff]  ;;  %v578_v34 = vld [vmem:[%s1051_s28 + $0x8] sm:$0xff]  ;;  %v580_v35 = vld [vmem:[%s1051_s28 + $0x10] sm:$0xff]  ;;  %s584_s21 = sadd.s32 1, %s1055_s14  ;;  %s570_s11 = sadd.s32 1, %s1059_s11   ;;  %s1059_s11 = sphi %s1057_s11, %s570_s11   ;;  %s1055_s14 = sphi %s1305_s14, %s1358_s14   ;;  %s1051_s28 = sphi %s1357_s28, %s589_s28   ;;  %s1047_s15 = sphi %s1356_s15, %s590_s15  }
  0xc3   : >> { %577 = vst [vmem:[%s1047_s15] sm:$0xff] %v576_v15  ;;  %579 = vst [vmem:[%s1047_s15 + $0x8] sm:$0xff] %v578_v34  ;;  %v582_v36 = vld [vmem:[%s1051_s28 + $0x18] sm:$0xff]  ;;  %p585_p5 = scmp.ge.s32.totalorder %s584_s21, %s1296_s23  ;;  %p569_p6 = scmp.ge.s32.totalorder %s570_s11, %s1296_s23 }
  0xc4   : >> { %581 = vst [vmem:[%s1047_s15 + $0x10] sm:$0xff] %v580_v35  ;;  %583 = vst [vmem:[%s1047_s15 + $0x18] sm:$0xff] %v582_v36 }
  0xc5   : >> { %s1380_s21 = smov (%p585_p5, %s584_s21), 0  ;;  %572 = sbr.rel (!%p569_p6) target bundleno = 194 (0xc2), region = 128 }
  0xc6   : >> { %s810_s22 = sshll.u32 %s1380_s21, 5  ;;  %s1358_s14 = smov %s1380_s21 }
  0xc7   : >> { %s589_s28 = scalar_lea.vmem %s1272_s12, %s810_s22 [#allocation2]   ;;  %s590_s15 = scalar_lea.vmem %s1293_s10, %s810_s22  }
  0xca PF: > { %s1321_s24 = sand.u32 3, %s1378_s29   ;;  %s830_s5 = sshll.u32 %s1296_s23, 5 }
  0xcb   : > { %s595_s25 = scalar_lea.vmem %s1272_s12, %s830_s5 [#allocation2]   ;;  %s597_s26 = scalar_lea.vmem %s1293_s10, %s830_s5  }
  0xcc   : > { %p815_p7 = scmp.le.s32.totalorder %s1321_s24, 0 }
  0xcd   : > { %s1061_s30 = smov (!%p815_p7), %s597_s26   ;;  %s1065_s4 = smov (!%p815_p7), %s595_s25  }
  0xce   : > { %721 = sbr.rel (%p815_p7) target bundleno = 219 (0xdb), region = 133  ;;  %s1069_s6 = smov (!%p815_p7), 0  }
  0xcf   : > { %s1073_s7 = smov (!%p815_p7), 0  }
  0xd3 LB: >> { %v607_v37 = vld [vmem:[%s1067_s4] sm:$0xff]  ;;  %s609_s29 = sadd.s32 1, %s1071_s6  ;;  %s601_s7 = sadd.s32 1, %s1075_s7   ;;  %s1075_s7 = sphi %s1073_s7, %s601_s7   ;;  %s1071_s6 = sphi %s1069_s6, %s1070_s6   ;;  %s1067_s4 = sphi %s1065_s4, %s614_s4   ;;  %s1063_s30 = sphi %s1061_s30, %s615_s30  }
  0xd4   : >> { %608 = vst [vmem:[%s1063_s30] sm:$0xff] %v607_v37  ;;  %p610_p8 = scmp.ge.s32.totalorder %s609_s29, %s1321_s24  ;;  %p600_p9 = scmp.ge.s32.totalorder %s601_s7, %s1321_s24 }
  0xd6   : >> { %s1382_s29 = smov (%p610_p8, %s609_s29), 0  ;;  %603 = sbr.rel (!%p600_p9) target bundleno = 211 (0xd3), region = 139 }
  0xd7   : >> { %s816_s12 = sshll.u32 %s1382_s29, 3  ;;  %s1070_s6 = smov %s1382_s29  }
  0xd8   : >> { %s614_s4 = scalar_lea.vmem %s595_s25, %s816_s12 [#allocation2]   ;;  %s615_s30 = scalar_lea.vmem %s597_s26, %s816_s12  }
  0xdb PF: > { %s13_s18 = sadd.s32 1, %s1043_s18   ;;  %s1359_s12 = smov %s1023_s13 }
  0xdc   : > { %p10_p10 = scmp.ge.s32.totalorder %s13_s18, 6   ;;  %s1360_s13 = smov %s1157_s27 }
  0xdd   : > { %s1361_s14 = smov %s1035_s16  ;;  %s1362_s15 = smov %s1039_s17 }
  0xde   : > { %s1363_s16 = smov %s1366_s19  ;;  %s1364_s17 = smov %s1370_s20 }
  0xdf   :  { %12 = sbr.rel (!%p10_p10) target bundleno = 4 (0x4), region = 150 }

</bundles_post_ra>
